<compile_context>
chip_gen: v6e
topology: v6e:2x2x1
jax: 0.10.0
libtpu: 0.0.40
codegen_flags: <defaults>
</compile_context>

<pallas_src>
import jax
import jax.numpy as jnp
from jax.experimental import pallas as pl
from jax.experimental.pallas import tpu as pltpu

HIDDEN = 10


def mlp_kernel(x_ref, w1_ref, b1_ref, w2_ref, b2_ref, o_ref):
    # x_ref  : (TILE_R, LANE) VMEM  — batch laid out as a dense 2D slab
    # w1_ref : (HIDDEN,) SMEM      — layer1.weight (column, flattened)
    # b1_ref : (HIDDEN,) SMEM      — layer1.bias
    # w2_ref : (HIDDEN,) SMEM      — layer2.weight (row, flattened)
    # b2_ref : (1,)      SMEM      — layer2.bias
    # o_ref  : (TILE_R, LANE) VMEM
    x = x_ref[...]
    acc = jnp.zeros_like(x)
    # Unrolled over the 10 hidden units: scalar splats from SMEM + VPU FMAs only.
    for k in range(HIDDEN):
        acc = acc + w2_ref[k] * jnp.maximum(w1_ref[k] * x + b1_ref[k], 0.0)
    o_ref[...] = acc + b2_ref[0]


def neural_network_forward(x, w1, b1, w2, b2, *, lane=512, tile_r=512):
    """Forward pass of Linear(1,10) -> ReLU -> Linear(10,1).

    x : (B, 1) f32
    w1: (10, 1) layer1.weight ; b1: (10,) layer1.bias   (PyTorch shapes)
    w2: (1, 10) layer2.weight ; b2: (1,)  layer2.bias
    returns (B, 1) f32
    """
    assert lane % 128 == 0 and tile_r % 8 == 0
    B = x.shape[0]

    # Lay the batch out as a (rows, lane) slab; clamp the row tile for tiny batches
    # so we do not pad a small problem up to a huge block.
    rows = pl.cdiv(B, lane)
    tile_r_eff = min(tile_r, pl.cdiv(rows, 8) * 8)
    rows_p = pl.cdiv(rows, tile_r_eff) * tile_r_eff
    bp = rows_p * lane

    x_slab = jnp.pad(x.reshape(B).astype(jnp.float32), (0, bp - B)).reshape(rows_p, lane)

    w1s = w1.reshape(HIDDEN).astype(jnp.float32)
    b1s = b1.reshape(HIDDEN).astype(jnp.float32)
    w2s = w2.reshape(HIDDEN).astype(jnp.float32)
    b2s = b2.reshape(1).astype(jnp.float32)

    grid = (rows_p // tile_r_eff,)

    out = pl.pallas_call(
        mlp_kernel,
        out_shape=jax.ShapeDtypeStruct((rows_p, lane), jnp.float32),
        grid=grid,
        in_specs=[
            pl.BlockSpec((tile_r_eff, lane), lambda i: (i, 0)),      # x batch tile
            pl.BlockSpec(memory_space=pltpu.MemorySpace.SMEM),       # w1 scalars
            pl.BlockSpec(memory_space=pltpu.MemorySpace.SMEM),       # b1 scalars
            pl.BlockSpec(memory_space=pltpu.MemorySpace.SMEM),       # w2 scalars
            pl.BlockSpec(memory_space=pltpu.MemorySpace.SMEM),       # b2 scalar
        ],
        out_specs=pl.BlockSpec((tile_r_eff, lane), lambda i: (i, 0)),
        compiler_params=pltpu.CompilerParams(
            dimension_semantics=("parallel",),
        ),
        cost_estimate=pl.CostEstimate(
            flops=20 * bp,            # ~10 FMAs per element
            bytes_accessed=8 * bp,    # read x, write out (f32)
            transcendentals=0,
        ),
    )(x_slab, w1s, b1s, w2s, b2s)

    # TODO(synk): for very large B, return the padded slab (or use a masked tail
    # store with a scalar-prefetched B) so the consumer avoids this slice copy.
    return out.reshape(bp)[:B].reshape(B, 1)


def init_params(key):
    """Deterministic init matching PyTorch nn.Linear default U(-1/sqrt(fan_in), +)."""
    k1, k2, k3, k4 = jax.random.split(key, 4)
    bound1 = 1.0                    # fan_in = 1
    bound2 = 1.0 / jnp.sqrt(10.0)   # fan_in = 10
    w1 = jax.random.uniform(k1, (10, 1), jnp.float32, -bound1, bound1)  # layer1.weight
    b1 = jax.random.uniform(k2, (10,), jnp.float32, -bound1, bound1)    # layer1.bias
    w2 = jax.random.uniform(k3, (1, 10), jnp.float32, -bound2, bound2)  # layer2.weight
    b2 = jax.random.uniform(k4, (1,), jnp.float32, -bound2, bound2)     # layer2.bias
    return w1, b1, w2, b2


if __name__ == "__main__":
    key = jax.random.PRNGKey(0)
    k_x, k_p = jax.random.split(key)

    batch = 300  # not a lane/tile multiple -> exercises padding + tail handling
    x = jax.random.normal(k_x, (batch, 1), jnp.float32)
    w1, b1, w2, b2 = init_params(k_p)

    # Default (perf) tiling — small batch auto-clamps to a single (8, 512) block.
    out = neural_network_forward(x, w1, b1, w2, b2)
    out = jax.block_until_ready(out)

    # Also exercise a multi-step grid with small tiles.
    out_small = neural_network_forward(x, w1, b1, w2, b2, lane=128, tile_r=8)
    out_small = jax.block_until_ready(out_small)

    # Pure-JAX reference (same math as the PyTorch forward).
    ref = jnp.maximum(x @ w1.T + b1, 0.0) @ w2.T + b2
    assert out.shape == (batch, 1)
    assert jnp.allclose(out, ref, atol=1e-5, rtol=1e-5)
    assert jnp.allclose(out_small, ref, atol=1e-5, rtol=1e-5)

    print("KERNEL_OK")
</pallas_src>

<mosaic_0001>
module attributes {stable_mosaic.version = 11 : i64} {
  func.func @mlp_kernel(%arg0: i32, %arg1: memref<8x512xf32, #tpu.memory_space<vmem>>, %arg2: memref<10xf32, #tpu.memory_space<smem>>, %arg3: memref<10xf32, #tpu.memory_space<smem>>, %arg4: memref<10xf32, #tpu.memory_space<smem>>, %arg5: memref<1xf32, #tpu.memory_space<smem>>, %arg6: memref<8x512xf32, #tpu.memory_space<vmem>>) attributes {dimension_semantics = [#tpu.dimension_semantics<parallel>], iteration_bounds = array<i64: 1>, scalar_prefetch = 0 : i64, scratch_operands = 0 : i64, tpu.core_type = #tpu.core_type<tc>, window_params = [{transform_indices = @transform_0, window_bounds = array<i64: 8, 512>}, {transform_indices = @transform_1, window_bounds = array<i64: 10>}, {transform_indices = @transform_2, window_bounds = array<i64: 10>}, {transform_indices = @transform_3, window_bounds = array<i64: 10>}, {transform_indices = @transform_4, window_bounds = array<i64: 1>}, {transform_indices = @transform_5, window_bounds = array<i64: 8, 512>}]} {
    %c0 = arith.constant 0 : index
    %c0_0 = arith.constant 0 : index
    %0 = vector.load %arg1[%c0, %c0_0] : memref<8x512xf32, #tpu.memory_space<vmem>>, vector<8x512xf32>
    %cst = arith.constant 0.000000e+00 : f32
    %1 = vector.broadcast %cst : f32 to vector<8x512xf32>
    %c0_1 = arith.constant 0 : index
    %2 = memref.load %arg4[%c0_1] : memref<10xf32, #tpu.memory_space<smem>>
    %c0_2 = arith.constant 0 : index
    %3 = memref.load %arg2[%c0_2] : memref<10xf32, #tpu.memory_space<smem>>
    %4 = vector.broadcast %3 : f32 to vector<8x512xf32>
    %5 = arith.mulf %4, %0 : vector<8x512xf32>
    %c0_3 = arith.constant 0 : index
    %6 = memref.load %arg3[%c0_3] : memref<10xf32, #tpu.memory_space<smem>>
    %7 = vector.broadcast %6 : f32 to vector<8x512xf32>
    %8 = arith.addf %5, %7 : vector<8x512xf32>
    %cst_4 = arith.constant 0.000000e+00 : f32
    %9 = vector.broadcast %cst_4 : f32 to vector<8x512xf32>
    %10 = arith.maximumf %8, %9 : vector<8x512xf32>
    %11 = vector.broadcast %2 : f32 to vector<8x512xf32>
    %12 = arith.mulf %11, %10 : vector<8x512xf32>
    %13 = arith.addf %1, %12 : vector<8x512xf32>
    %c1 = arith.constant 1 : index
    %14 = memref.load %arg4[%c1] : memref<10xf32, #tpu.memory_space<smem>>
    %c1_5 = arith.constant 1 : index
    %15 = memref.load %arg2[%c1_5] : memref<10xf32, #tpu.memory_space<smem>>
    %16 = vector.broadcast %15 : f32 to vector<8x512xf32>
    %17 = arith.mulf %16, %0 : vector<8x512xf32>
    %c1_6 = arith.constant 1 : index
    %18 = memref.load %arg3[%c1_6] : memref<10xf32, #tpu.memory_space<smem>>
    %19 = vector.broadcast %18 : f32 to vector<8x512xf32>
    %20 = arith.addf %17, %19 : vector<8x512xf32>
    %cst_7 = arith.constant 0.000000e+00 : f32
    %21 = vector.broadcast %cst_7 : f32 to vector<8x512xf32>
    %22 = arith.maximumf %20, %21 : vector<8x512xf32>
    %23 = vector.broadcast %14 : f32 to vector<8x512xf32>
    %24 = arith.mulf %23, %22 : vector<8x512xf32>
    %25 = arith.addf %13, %24 : vector<8x512xf32>
    %c2 = arith.constant 2 : index
    %26 = memref.load %arg4[%c2] : memref<10xf32, #tpu.memory_space<smem>>
    %c2_8 = arith.constant 2 : index
    %27 = memref.load %arg2[%c2_8] : memref<10xf32, #tpu.memory_space<smem>>
    %28 = vector.broadcast %27 : f32 to vector<8x512xf32>
    %29 = arith.mulf %28, %0 : vector<8x512xf32>
    %c2_9 = arith.constant 2 : index
    %30 = memref.load %arg3[%c2_9] : memref<10xf32, #tpu.memory_space<smem>>
    %31 = vector.broadcast %30 : f32 to vector<8x512xf32>
    %32 = arith.addf %29, %31 : vector<8x512xf32>
    %cst_10 = arith.constant 0.000000e+00 : f32
    %33 = vector.broadcast %cst_10 : f32 to vector<8x512xf32>
    %34 = arith.maximumf %32, %33 : vector<8x512xf32>
    %35 = vector.broadcast %26 : f32 to vector<8x512xf32>
    %36 = arith.mulf %35, %34 : vector<8x512xf32>
    %37 = arith.addf %25, %36 : vector<8x512xf32>
    %c3 = arith.constant 3 : index
    %38 = memref.load %arg4[%c3] : memref<10xf32, #tpu.memory_space<smem>>
    %c3_11 = arith.constant 3 : index
    %39 = memref.load %arg2[%c3_11] : memref<10xf32, #tpu.memory_space<smem>>
    %40 = vector.broadcast %39 : f32 to vector<8x512xf32>
    %41 = arith.mulf %40, %0 : vector<8x512xf32>
    %c3_12 = arith.constant 3 : index
    %42 = memref.load %arg3[%c3_12] : memref<10xf32, #tpu.memory_space<smem>>
    %43 = vector.broadcast %42 : f32 to vector<8x512xf32>
    %44 = arith.addf %41, %43 : vector<8x512xf32>
    %cst_13 = arith.constant 0.000000e+00 : f32
    %45 = vector.broadcast %cst_13 : f32 to vector<8x512xf32>
    %46 = arith.maximumf %44, %45 : vector<8x512xf32>
    %47 = vector.broadcast %38 : f32 to vector<8x512xf32>
    %48 = arith.mulf %47, %46 : vector<8x512xf32>
    %49 = arith.addf %37, %48 : vector<8x512xf32>
    %c4 = arith.constant 4 : index
    %50 = memref.load %arg4[%c4] : memref<10xf32, #tpu.memory_space<smem>>
    %c4_14 = arith.constant 4 : index
    %51 = memref.load %arg2[%c4_14] : memref<10xf32, #tpu.memory_space<smem>>
    %52 = vector.broadcast %51 : f32 to vector<8x512xf32>
    %53 = arith.mulf %52, %0 : vector<8x512xf32>
    %c4_15 = arith.constant 4 : index
    %54 = memref.load %arg3[%c4_15] : memref<10xf32, #tpu.memory_space<smem>>
    %55 = vector.broadcast %54 : f32 to vector<8x512xf32>
    %56 = arith.addf %53, %55 : vector<8x512xf32>
    %cst_16 = arith.constant 0.000000e+00 : f32
    %57 = vector.broadcast %cst_16 : f32 to vector<8x512xf32>
    %58 = arith.maximumf %56, %57 : vector<8x512xf32>
    %59 = vector.broadcast %50 : f32 to vector<8x512xf32>
    %60 = arith.mulf %59, %58 : vector<8x512xf32>
    %61 = arith.addf %49, %60 : vector<8x512xf32>
    %c5 = arith.constant 5 : index
    %62 = memref.load %arg4[%c5] : memref<10xf32, #tpu.memory_space<smem>>
    %c5_17 = arith.constant 5 : index
    %63 = memref.load %arg2[%c5_17] : memref<10xf32, #tpu.memory_space<smem>>
    %64 = vector.broadcast %63 : f32 to vector<8x512xf32>
    %65 = arith.mulf %64, %0 : vector<8x512xf32>
    %c5_18 = arith.constant 5 : index
    %66 = memref.load %arg3[%c5_18] : memref<10xf32, #tpu.memory_space<smem>>
    %67 = vector.broadcast %66 : f32 to vector<8x512xf32>
    %68 = arith.addf %65, %67 : vector<8x512xf32>
    %cst_19 = arith.constant 0.000000e+00 : f32
    %69 = vector.broadcast %cst_19 : f32 to vector<8x512xf32>
    %70 = arith.maximumf %68, %69 : vector<8x512xf32>
    %71 = vector.broadcast %62 : f32 to vector<8x512xf32>
    %72 = arith.mulf %71, %70 : vector<8x512xf32>
    %73 = arith.addf %61, %72 : vector<8x512xf32>
    %c6 = arith.constant 6 : index
    %74 = memref.load %arg4[%c6] : memref<10xf32, #tpu.memory_space<smem>>
    %c6_20 = arith.constant 6 : index
    %75 = memref.load %arg2[%c6_20] : memref<10xf32, #tpu.memory_space<smem>>
    %76 = vector.broadcast %75 : f32 to vector<8x512xf32>
    %77 = arith.mulf %76, %0 : vector<8x512xf32>
    %c6_21 = arith.constant 6 : index
    %78 = memref.load %arg3[%c6_21] : memref<10xf32, #tpu.memory_space<smem>>
    %79 = vector.broadcast %78 : f32 to vector<8x512xf32>
    %80 = arith.addf %77, %79 : vector<8x512xf32>
    %cst_22 = arith.constant 0.000000e+00 : f32
    %81 = vector.broadcast %cst_22 : f32 to vector<8x512xf32>
    %82 = arith.maximumf %80, %81 : vector<8x512xf32>
    %83 = vector.broadcast %74 : f32 to vector<8x512xf32>
    %84 = arith.mulf %83, %82 : vector<8x512xf32>
    %85 = arith.addf %73, %84 : vector<8x512xf32>
    %c7 = arith.constant 7 : index
    %86 = memref.load %arg4[%c7] : memref<10xf32, #tpu.memory_space<smem>>
    %c7_23 = arith.constant 7 : index
    %87 = memref.load %arg2[%c7_23] : memref<10xf32, #tpu.memory_space<smem>>
    %88 = vector.broadcast %87 : f32 to vector<8x512xf32>
    %89 = arith.mulf %88, %0 : vector<8x512xf32>
    %c7_24 = arith.constant 7 : index
    %90 = memref.load %arg3[%c7_24] : memref<10xf32, #tpu.memory_space<smem>>
    %91 = vector.broadcast %90 : f32 to vector<8x512xf32>
    %92 = arith.addf %89, %91 : vector<8x512xf32>
    %cst_25 = arith.constant 0.000000e+00 : f32
    %93 = vector.broadcast %cst_25 : f32 to vector<8x512xf32>
    %94 = arith.maximumf %92, %93 : vector<8x512xf32>
    %95 = vector.broadcast %86 : f32 to vector<8x512xf32>
    %96 = arith.mulf %95, %94 : vector<8x512xf32>
    %97 = arith.addf %85, %96 : vector<8x512xf32>
    %c8 = arith.constant 8 : index
    %98 = memref.load %arg4[%c8] : memref<10xf32, #tpu.memory_space<smem>>
    %c8_26 = arith.constant 8 : index
    %99 = memref.load %arg2[%c8_26] : memref<10xf32, #tpu.memory_space<smem>>
    %100 = vector.broadcast %99 : f32 to vector<8x512xf32>
    %101 = arith.mulf %100, %0 : vector<8x512xf32>
    %c8_27 = arith.constant 8 : index
    %102 = memref.load %arg3[%c8_27] : memref<10xf32, #tpu.memory_space<smem>>
    %103 = vector.broadcast %102 : f32 to vector<8x512xf32>
    %104 = arith.addf %101, %103 : vector<8x512xf32>
    %cst_28 = arith.constant 0.000000e+00 : f32
    %105 = vector.broadcast %cst_28 : f32 to vector<8x512xf32>
    %106 = arith.maximumf %104, %105 : vector<8x512xf32>
    %107 = vector.broadcast %98 : f32 to vector<8x512xf32>
    %108 = arith.mulf %107, %106 : vector<8x512xf32>
    %109 = arith.addf %97, %108 : vector<8x512xf32>
    %c9 = arith.constant 9 : index
    %110 = memref.load %arg4[%c9] : memref<10xf32, #tpu.memory_space<smem>>
    %c9_29 = arith.constant 9 : index
    %111 = memref.load %arg2[%c9_29] : memref<10xf32, #tpu.memory_space<smem>>
    %112 = vector.broadcast %111 : f32 to vector<8x512xf32>
    %113 = arith.mulf %112, %0 : vector<8x512xf32>
    %c9_30 = arith.constant 9 : index
    %114 = memref.load %arg3[%c9_30] : memref<10xf32, #tpu.memory_space<smem>>
    %115 = vector.broadcast %114 : f32 to vector<8x512xf32>
    %116 = arith.addf %113, %115 : vector<8x512xf32>
    %cst_31 = arith.constant 0.000000e+00 : f32
    %117 = vector.broadcast %cst_31 : f32 to vector<8x512xf32>
    %118 = arith.maximumf %116, %117 : vector<8x512xf32>
    %119 = vector.broadcast %110 : f32 to vector<8x512xf32>
    %120 = arith.mulf %119, %118 : vector<8x512xf32>
    %121 = arith.addf %109, %120 : vector<8x512xf32>
    %c0_32 = arith.constant 0 : index
    %122 = memref.load %arg5[%c0_32] : memref<1xf32, #tpu.memory_space<smem>>
    %123 = vector.broadcast %122 : f32 to vector<8x512xf32>
    %124 = arith.addf %121, %123 : vector<8x512xf32>
    %c0_33 = arith.constant 0 : index
    %c0_34 = arith.constant 0 : index
    %125 = vector.load %arg6[%c0_33, %c0_34] : memref<8x512xf32, #tpu.memory_space<vmem>>, vector<8x512xf32>
    tpu.vector_store %arg6[%c0_33, %c0_34], %124 {strides = array<i32>} : memref<8x512xf32, #tpu.memory_space<vmem>>, vector<8x512xf32>,
    return
  }
  func.func @transform_0(%arg0: i32) -> (i32, i32) {
    %c0_i32 = arith.constant 0 : i32
    %c0_i32_0 = arith.constant 0 : i32
    return %arg0, %c0_i32 : i32, i32
  }
  func.func @transform_1(%arg0: i32) -> i32 {
    %c0_i32 = arith.constant 0 : i32
    %c0_i32_0 = arith.constant 0 : i32
    return %c0_i32 : i32
  }
  func.func @transform_2(%arg0: i32) -> i32 {
    %c0_i32 = arith.constant 0 : i32
    %c0_i32_0 = arith.constant 0 : i32
    return %c0_i32 : i32
  }
  func.func @transform_3(%arg0: i32) -> i32 {
    %c0_i32 = arith.constant 0 : i32
    %c0_i32_0 = arith.constant 0 : i32
    return %c0_i32 : i32
  }
  func.func @transform_4(%arg0: i32) -> i32 {
    %c0_i32 = arith.constant 0 : i32
    %c0_i32_0 = arith.constant 0 : i32
    return %c0_i32 : i32
  }
  func.func @transform_5(%arg0: i32) -> (i32, i32) {
    %c0_i32 = arith.constant 0 : i32
    %c0_i32_0 = arith.constant 0 : i32
    return %arg0, %c0_i32 : i32, i32
  }
}

</mosaic_0001>

<bundles_post_ra>
// kernel: tpu_custom_call.1
= control target key start
LH: loop header
LB: loop body
LE: loop exit
PB: predicated region body
PF: predicated region fallthrough
CT: control target
= control target key end

     0   :  { %11 = vsyncpa [#allocation4], 0  ;;  %s769_s0 = inlined_call_operand.hbm [shape: f32[8,512], index: 0, kind: input, shape index: {}]   ;;  %s770_s1 = inlined_call_operand.vmem [shape: f32[10], index: 1, kind: input, shape index: {}]   ;;  %s771_s2 = inlined_call_operand.vmem [shape: f32[10], index: 2, kind: input, shape index: {}]   ;;  %s772_s3 = inlined_call_operand.vmem [shape: f32[10], index: 3, kind: input, shape index: {}]   ;;  %s773_s4 = inlined_call_operand.<no memory space> [shape: f32[1], index: 4, kind: input, shape index: {}]   ;;  %s774_s5 = inlined_call_operand.hbm [shape: f32[8,512], index: 5, kind: output, shape index: {}]  }
   0x1   :  { %12 = vsyncpa [#allocation6], 0 }
   0x2   :  { %13 = vsyncpa [#allocation9], 0  ;;  %s41_s20 = sshll.u32 %s771_s2, 4  ;;  %s42_s20 = int_to_ptr.vmem [resolvable:$true] %s41_s20 }
   0x3   :  { %14 = vsyncpa [#allocation5], 0  ;;  %s393_s21 = scalar_lea.vmem %s42_s20, 16  ;;  %p398_p1 = scmp.lt.s32.totalorder %s42_s20, %s42_s20 }
   0x4   :  { %p394_p0 = scmp.ne.s32.totalorder %s42_s20, %s393_s21  ;;  %p399_p2 = scmp.lt.s32.totalorder %s393_s21, %s393_s21 }
   0x6   :  { %p400_p3 = por %p399_p2, %p398_p1 }
   0x8   :  { %p401_p4 = pnand %p400_p3, %p394_p0 }
   0xa   :  { %404 = shalt.err (!%p401_p4)
}
   0xb   :  { %s477_s22 = smov [#allocation8]   ;;  %s478_s23 = smov [#allocation3]  }
   0xc   :  { %44 = dma.vmem_to_smem %s42_s20, 16, %s477_s22, [#allocation9]  }
   0xd   :  { %s21_s24 = sshll.u32 %s478_s23, 4  ;;  %s31_s27 = sshll.u32 %s770_s1, 4  ;;  %s22_s24 = int_to_ptr.vmem [resolvable:$true] %s21_s24  ;;  %s32_s27 = int_to_ptr.vmem [resolvable:$true] %s31_s27 }
   0xe   :  { %s413_s2 = scalar_lea.vmem %s22_s24, 512  ;;  %p418_p6 = scmp.lt.s32.totalorder %s22_s24, %s22_s24 }
   0xf   :  { %p414_p5 = scmp.ne.s32.totalorder %s22_s24, %s413_s2  ;;  %p419_p7 = scmp.lt.s32.totalorder %s413_s2, %s413_s2 }
  0x11   :  { %p420_p8 = por %p419_p7, %p418_p6 }
  0x13   :  { %p421_p9 = pnand %p420_p8, %p414_p5 }
  0x15   :  { %424 = shalt.err (!%p421_p9)
}
  0x16   :  { %24 = dma.hbm_to_vmem [thread:$0]  %s769_s0, 512, %s22_s24, [#allocation4]  }
  0x17   :  { %s51_s7 = sshll.u32 %s772_s3, 4  ;;  %s425_s8 = scalar_lea.vmem %s32_s27, 16  ;;  %s52_s7 = int_to_ptr.vmem [resolvable:$true] %s51_s7 }
  0x18   :  { %p426_p10 = scmp.ne.s32.totalorder %s32_s27, %s425_s8  ;;  %p430_p11 = scmp.lt.s32.totalorder %s32_s27, %s32_s27 }
  0x19   :  { %p431_p12 = scmp.lt.s32.totalorder %s425_s8, %s425_s8 }
  0x1b   :  { %p432_p13 = por %p431_p12, %p430_p11 }
  0x1d   :  { %p433_p0 = pnand %p432_p13, %p426_p10 }
  0x1f   :  { %436 = shalt.err (!%p433_p0)
}
  0x20   :  { %s479_s1 = smov [#allocation7]   ;;  %s437_s9 = scalar_lea.vmem %s52_s7, 16 }
  0x21   :  { %34 = dma.vmem_to_smem %s32_s27, 16, %s479_s1, [#allocation6]  }
  0x22   :  { %p438_p1 = scmp.ne.s32.totalorder %s52_s7, %s437_s9  ;;  %p442_p2 = scmp.lt.s32.totalorder %s52_s7, %s52_s7 }
  0x23   :  { %p443_p3 = scmp.lt.s32.totalorder %s437_s9, %s437_s9 }
  0x25   :  { %p444_p4 = por %p443_p3, %p442_p2 }
  0x27   :  { %p445_p5 = pnand %p444_p4, %p438_p1 }
  0x29   :  { %448 = shalt.err (!%p445_p5)
}
  0x2a   :  { %s480_s0 = smov [#allocation10]  }
  0x2b   :  { %54 = dma.vmem_to_smem %s52_s7, 16, %s480_s0, [#allocation9]  }
  0x2c   :  { %469 = dma.done.wait [#allocation4], 512  }
  0x2d   :  { %470 = vsyncadd [#allocation4], 4294966784 }
  0x2e   :  { %471 = dma.done.wait [#allocation6], 16  }
  0x2f   :  { %472 = vsyncadd [#allocation6], 4294967280 }
  0x30   :  { %473 = dma.done.wait [#allocation9], 32  }
  0x31   :  { %474 = vsyncadd [#allocation9], 4294967264 }
  0x32   :  { %69 = sfence }
  0x33   :  { %s74_s3 = sld [smem:[#allocation10]]  ;;  %v524_v0 = vld [vmem:[#allocation3] sm:$0xff]  ;;  %v526_v1 = vld [vmem:[#allocation3 + $0x8] sm:$0xff]  ;;  %v528_v2 = vld [vmem:[#allocation3 + $0x10] sm:$0xff]  ;;  %v544_v11 = vstv %s773_s4 }
  0x34   :  { %s75_s10 = sld [smem:[#allocation7]]  ;;  %v530_v3 = vld [vmem:[#allocation3 + $0x18] sm:$0xff] }
  0x35   :  { %s81_s11 = sld [smem:[#allocation8]] }
  0x36   :  { %s361_s12 = sld [smem:[#allocation10 + $0x1]] }
  0x37   :  { %s362_s13 = sld [smem:[#allocation7 + $0x1]] }
  0x38   :  { %s363_s14 = sld [smem:[#allocation8 + $0x1]] }
  0x39   :  { %s364_s15 = sld [smem:[#allocation10 + $0x2]]  ;;  %v537_v9 = vstv %s74_s3 }
  0x3a   :  { %v76_v4 = vstv %s75_s10  ;;  %s365_s16 = sld [smem:[#allocation7 + $0x2]] }
  0x3b   :  { %v77_v5 = vmul.f32 %v76_v4, %v524_v0  ;;  %v533_v6 = vstv %s81_s11  ;;  %s366_s17 = sld [smem:[#allocation8 + $0x2]]  ;;  %v78_v7 = vmul.f32 %v76_v4, %v526_v1  ;;  %v79_v8 = vmul.f32 %v76_v4, %v528_v2  ;;  %s481_s11 = smov [#allocation11]  }
  0x3c   :  { %v539_v10 = vstv %s361_s12  ;;  %s367_s18 = sld [smem:[#allocation10 + $0x3]]  ;;  %v547_v12 = vmul.f32 %v76_v4, %v530_v3  ;;  %s350_s12 = sshll.u32 %s481_s11, 4  ;;  %s351_s12 = int_to_ptr.vmem [resolvable:$true] %s350_s12 }
  0x3d   :  { %v83_v13 = vadd.f32 %v533_v6, %v77_v5  ;;  %v550_v14 = vstv %s362_s13  ;;  %s368_s21 = sld [smem:[#allocation7 + $0x3]]  ;;  %v84_v15 = vadd.f32 %v533_v6, %v78_v7  ;;  %v85_v16 = vadd.f32 %v533_v6, %v79_v8  ;;  %s449_s13 = scalar_lea.vmem %s351_s12, 512 }
  0x3e   :  { %v103_v17 = vmul.f32 %v550_v14, %v524_v0  ;;  %v556_v18 = vstv %s363_s14  ;;  %s369_s22 = sld [smem:[#allocation8 + $0x3]]  ;;  %v104_v19 = vmul.f32 %v550_v14, %v526_v1  ;;  %v105_v20 = vmul.f32 %v550_v14, %v528_v2  ;;  %p450_p6 = scmp.ne.s32.totalorder %s351_s12, %s449_s13 }
  0x3f   :  { %v87_v21 = vmax.f32 %v83_v13, 0.0  ;;  %v562_v22 = vstv %s364_s15  ;;  %s370_s4 = sld [smem:[#allocation10 + $0x4]]  ;;  %v88_v23 = vmax.f32 %v84_v15, 0.0  ;;  %v89_v24 = vmax.f32 %v85_v16, 0.0  ;;  %p454_p7 = scmp.lt.s32.totalorder %s351_s12, %s351_s12 }
  0x40   :  { %v109_v25 = vadd.f32 %v556_v18, %v103_v17  ;;  %v565_v26 = vstv %s365_s16  ;;  %s371_s23 = sld [smem:[#allocation7 + $0x4]]  ;;  %v110_v27 = vadd.f32 %v556_v18, %v104_v19  ;;  %v569_v28 = vadd.f32 %v556_v18, %v105_v20  ;;  %p455_p8 = scmp.lt.s32.totalorder %s449_s13, %s449_s13 }
  0x41   :  { %v92_v29 = vmul.f32 %v537_v9, %v87_v21  ;;  %v129_v30 = vmul.f32 %v565_v26, %v524_v0  ;;  %v574_v31 = vstv %s366_s17  ;;  %s372_s24 = sld [smem:[#allocation8 + $0x4]]  ;;  %v93_v32 = vmul.f32 %v537_v9, %v88_v23 }
  0x42   :  { %v113_v33 = vmax.f32 %v109_v25, 0.0  ;;  %v577_v34 = vstv %s367_s18  ;;  %s373_s25 = sld [smem:[#allocation10 + $0x5]]  ;;  %v114_v35 = vmax.f32 %v110_v27, 0.0  ;;  %v130_v36 = vmul.f32 %v565_v26, %v526_v1  ;;  %p456_p9 = por %p455_p8, %p454_p7 }
  0x43   :  { %v135_v37 = vadd.f32 %v574_v31, %v129_v30  ;;  %v582_v38 = vstv %s368_s21  ;;  %s374_s26 = sld [smem:[#allocation7 + $0x5]]  ;;  %v585_v39 = vmul.f32 %v537_v9, %v89_v24  ;;  %v115_v40 = vmax.f32 %v569_v28, 0.0 }
  0x44   :  { %v118_v41 = vmul.f32 %v539_v10, %v113_v33  ;;  %v155_v42 = vmul.f32 %v582_v38, %v524_v0  ;;  %v591_v43 = vstv %s369_s22  ;;  %s375_s27 = sld [smem:[#allocation8 + $0x5]]  ;;  %v119_v44 = vmul.f32 %v539_v10, %v114_v35  ;;  %p457_p10 = pnand %p456_p9, %p450_p6 }
  0x45   :  { %v139_v45 = vmax.f32 %v135_v37, 0.0  ;;  %v594_v46 = vstv %s370_s4  ;;  %s376_s2 = sld [smem:[#allocation10 + $0x6]]  ;;  %v136_v47 = vadd.f32 %v574_v31, %v130_v36  ;;  %v156_v48 = vmul.f32 %v582_v38, %v526_v1 }
  0x46   :  { %v122_v49 = vadd.f32 %v118_v41, %v92_v29  ;;  %v161_v50 = vadd.f32 %v591_v43, %v155_v42  ;;  %v600_v51 = vstv %s371_s23  ;;  %s377_s28 = sld [smem:[#allocation7 + $0x6]]  ;;  %v123_v52 = vadd.f32 %v119_v44, %v93_v32 }
  0x47   :  { %v144_v53 = vmul.f32 %v562_v22, %v139_v45  ;;  %v181_v54 = vmul.f32 %v600_v51, %v524_v0  ;;  %v605_v55 = vstv %s372_s24  ;;  %s378_s29 = sld [smem:[#allocation8 + $0x6]]  ;;  %v140_v56 = vmax.f32 %v136_v47, 0.0 }
  0x48   :  { %v165_v57 = vmax.f32 %v161_v50, 0.0  ;;  %v607_v58 = vstv %s373_s25  ;;  %s379_s30 = sld [smem:[#allocation10 + $0x7]]  ;;  %v162_v59 = vadd.f32 %v591_v43, %v156_v48  ;;  %v182_v60 = vmul.f32 %v600_v51, %v526_v1 }
  0x49   :  { %v148_v61 = vadd.f32 %v144_v53, %v122_v49  ;;  %v187_v62 = vadd.f32 %v605_v55, %v181_v54  ;;  %v613_v63 = vstv %s374_s26  ;;  %s380_s6 = sld [smem:[#allocation7 + $0x7]]  ;;  %v145_v4 = vmul.f32 %v562_v22, %v140_v56 }
  0x4a   :  { %v170_v5 = vmul.f32 %v577_v34, %v165_v57  ;;  %v207_v7 = vmul.f32 %v613_v63, %v524_v0  ;;  %v619_v8 = vstv %s375_s27  ;;  %s381_s7 = sld [smem:[#allocation8 + $0x7]]  ;;  %v166_v13 = vmax.f32 %v162_v59, 0.0 }
  0x4b   :  { %v191_v15 = vmax.f32 %v187_v62, 0.0  ;;  %v621_v16 = vstv %s376_s2  ;;  %s382_s8 = sld [smem:[#allocation10 + $0x8]]  ;;  %v149_v17 = vadd.f32 %v145_v4, %v123_v52  ;;  %v188_v19 = vadd.f32 %v605_v55, %v182_v60 }
  0x4c   :  { %v174_v20 = vadd.f32 %v170_v5, %v148_v61  ;;  %v213_v21 = vadd.f32 %v619_v8, %v207_v7  ;;  %v625_v23 = vstv %s377_s28  ;;  %s383_s1 = sld [smem:[#allocation7 + $0x8]]  ;;  %v171_v24 = vmul.f32 %v577_v34, %v166_v13 }
  0x4d   :  { %v196_v25 = vmul.f32 %v594_v46, %v191_v15  ;;  %v233_v27 = vmul.f32 %v625_v23, %v524_v0  ;;  %v631_v29 = vstv %s378_s29  ;;  %s384_s9 = sld [smem:[#allocation8 + $0x8]]  ;;  %v192_v30 = vmax.f32 %v188_v19, 0.0 }
  0x4e   :  { %v217_v32 = vmax.f32 %v213_v21, 0.0  ;;  %v633_v33 = vstv %s379_s30  ;;  %s385_s0 = sld [smem:[#allocation10 + $0x9]]  ;;  %v175_v35 = vadd.f32 %v171_v24, %v149_v17  ;;  %v208_v36 = vmul.f32 %v613_v63, %v526_v1 }
  0x4f   :  { %v200_v37 = vadd.f32 %v196_v25, %v174_v20  ;;  %v239_v41 = vadd.f32 %v631_v29, %v233_v27  ;;  %v638_v42 = vstv %s380_s6  ;;  %s386_s3 = sld [smem:[#allocation7 + $0x9]]  ;;  %v197_v44 = vmul.f32 %v594_v46, %v192_v30 }
  0x50   :  { %v222_v45 = vmul.f32 %v607_v58, %v217_v32  ;;  %v259_v47 = vmul.f32 %v638_v42, %v524_v0  ;;  %v644_v48 = vstv %s381_s7  ;;  %s387_s10 = sld [smem:[#allocation8 + $0x9]]  ;;  %v214_v49 = vadd.f32 %v619_v8, %v208_v36 }
  0x51   :  { %v243_v50 = vmax.f32 %v239_v41, 0.0  ;;  %v647_v52 = vstv %s382_s8  ;;  %v201_v53 = vadd.f32 %v197_v44, %v175_v35  ;;  %v234_v54 = vmul.f32 %v625_v23, %v526_v1 }
  0x52   :  { %v226_v56 = vadd.f32 %v222_v45, %v200_v37  ;;  %v265_v57 = vadd.f32 %v644_v48, %v259_v47  ;;  %v652_v59 = vstv %s383_s1  ;;  %v218_v60 = vmax.f32 %v214_v49, 0.0 }
  0x53   :  { %v248_v61 = vmul.f32 %v621_v16, %v243_v50  ;;  %v285_v62 = vmul.f32 %v652_v59, %v524_v0  ;;  %v657_v4 = vstv %s384_s9  ;;  %v240_v5 = vadd.f32 %v631_v29, %v234_v54 }
  0x54   :  { %v269_v7 = vmax.f32 %v265_v57, 0.0  ;;  %v660_v13 = vstv %s385_s0  ;;  %v223_v15 = vmul.f32 %v607_v58, %v218_v60  ;;  %v260_v17 = vmul.f32 %v638_v42, %v526_v1 }
  0x55   :  { %v252_v19 = vadd.f32 %v248_v61, %v226_v56  ;;  %v291_v20 = vadd.f32 %v657_v4, %v285_v62  ;;  %v666_v21 = vstv %s386_s3  ;;  %v244_v24 = vmax.f32 %v240_v5, 0.0 }
  0x56   :  { %v274_v25 = vmul.f32 %v633_v33, %v269_v7  ;;  %v311_v27 = vmul.f32 %v666_v21, %v524_v0  ;;  %v671_v30 = vstv %s387_s10  ;;  %v227_v32 = vadd.f32 %v223_v15, %v201_v53 }
  0x57   :  { %v295_v35 = vmax.f32 %v291_v20, 0.0  ;;  %v249_v36 = vmul.f32 %v621_v16, %v244_v24  ;;  %v266_v37 = vadd.f32 %v644_v48, %v260_v17  ;;  %v286_v41 = vmul.f32 %v652_v59, %v526_v1 }
  0x58   :  { %v278_v44 = vadd.f32 %v274_v25, %v252_v19  ;;  %v317_v45 = vadd.f32 %v671_v30, %v311_v27  ;;  %v312_v47 = vmul.f32 %v666_v21, %v526_v1  ;;  %v120_v0 = vmul.f32 %v539_v10, %v115_v40 }
  0x59   :  { %v300_v49 = vmul.f32 %v647_v52, %v295_v35  ;;  %v253_v50 = vadd.f32 %v249_v36, %v227_v32  ;;  %v270_v53 = vmax.f32 %v266_v37, 0.0  ;;  %v292_v54 = vadd.f32 %v657_v4, %v286_v41 }
  0x5a   :  { %v321_v56 = vmax.f32 %v317_v45, 0.0  ;;  %v318_v57 = vadd.f32 %v671_v30, %v312_v47  ;;  %v124_v60 = vadd.f32 %v120_v0, %v585_v39  ;;  %v131_v61 = vmul.f32 %v565_v26, %v528_v2 }
  0x5b   :  { %v304_v62 = vadd.f32 %v300_v49, %v278_v44  ;;  %v275_v1 = vmul.f32 %v633_v33, %v270_v53  ;;  %v296_v28 = vmax.f32 %v292_v54, 0.0  ;;  %v157_v40 = vmul.f32 %v582_v38, %v528_v2 }
  0x5c   :  { %v326_v5 = vmul.f32 %v660_v13, %v321_v56  ;;  %v322_v7 = vmax.f32 %v318_v57, 0.0  ;;  %v137_v15 = vadd.f32 %v574_v31, %v131_v61  ;;  %v183_v17 = vmul.f32 %v600_v51, %v528_v2 }
  0x5d   :  { %v279_v19 = vadd.f32 %v275_v1, %v253_v50  ;;  %v301_v39 = vmul.f32 %v647_v52, %v296_v28  ;;  %v163_v20 = vadd.f32 %v591_v43, %v157_v40  ;;  %v209_v24 = vmul.f32 %v613_v63, %v528_v2 }
  0x5e   :  { %v330_v25 = vadd.f32 %v326_v5, %v304_v62  ;;  %v327_v27 = vmul.f32 %v660_v13, %v322_v7  ;;  %v141_v32 = vmax.f32 %v137_v15, 0.0  ;;  %v189_v35 = vadd.f32 %v605_v55, %v183_v17 }
  0x5f   :  { %v305_v36 = vadd.f32 %v301_v39, %v279_v19  ;;  %v167_v37 = vmax.f32 %v163_v20, 0.0  ;;  %v215_v41 = vadd.f32 %v619_v8, %v209_v24  ;;  %v235_v44 = vmul.f32 %v625_v23, %v528_v2 }
  0x60   :  { %v336_v45 = vadd.f32 %v544_v11, %v330_v25  ;;  %v146_v47 = vmul.f32 %v562_v22, %v141_v32  ;;  %v193_v0 = vmax.f32 %v189_v35, 0.0  ;;  %v261_v49 = vmul.f32 %v638_v42, %v528_v2 }
  0x61   :  { %v331_v50 = vadd.f32 %v327_v27, %v305_v36  ;;  %v172_v53 = vmul.f32 %v577_v34, %v167_v37  ;;  %v219_v54 = vmax.f32 %v215_v41, 0.0  ;;  %v241_v56 = vadd.f32 %v631_v29, %v235_v44 }
  0x62   :  { %340 = vst [vmem:[#allocation11] sm:$0xff] %v336_v45  ;;  %v150_v57 = vadd.f32 %v146_v47, %v124_v60  ;;  %v198_v61 = vmul.f32 %v594_v46, %v193_v0  ;;  %v267_v62 = vadd.f32 %v644_v48, %v261_v49  ;;  %v287_v1 = vmul.f32 %v652_v59, %v528_v2 }
  0x63   :  { %v337_v28 = vadd.f32 %v544_v11, %v331_v50  ;;  %v224_v40 = vmul.f32 %v607_v58, %v219_v54  ;;  %v245_v5 = vmax.f32 %v241_v56, 0.0  ;;  %v313_v7 = vmul.f32 %v666_v21, %v528_v2 }
  0x64   :  { %v176_v15 = vadd.f32 %v172_v53, %v150_v57  ;;  %v271_v17 = vmax.f32 %v267_v62, 0.0  ;;  %v293_v19 = vadd.f32 %v657_v4, %v287_v1  ;;  %v86_v60 = vadd.f32 %v533_v6, %v547_v12 }
  0x65   :  { %341 = vst [vmem:[#allocation11 + $0x8] sm:$0xff] %v337_v28  ;;  %v250_v39 = vmul.f32 %v621_v16, %v245_v5  ;;  %v319_v20 = vadd.f32 %v671_v30, %v313_v7  ;;  %v106_v24 = vmul.f32 %v550_v14, %v530_v3  ;;  %v132_v25 = vmul.f32 %v565_v26, %v530_v3 }
  0x66   :  { %v202_v27 = vadd.f32 %v198_v61, %v176_v15  ;;  %v276_v2 = vmul.f32 %v633_v33, %v271_v17  ;;  %v297_v32 = vmax.f32 %v293_v19, 0.0  ;;  %v90_v35 = vmax.f32 %v86_v60, 0.0 }
  0x67   :  { %v323_v36 = vmax.f32 %v319_v20, 0.0  ;;  %v112_v37 = vadd.f32 %v556_v18, %v106_v24  ;;  %v138_v6 = vadd.f32 %v574_v31, %v132_v25  ;;  %v158_v12 = vmul.f32 %v582_v38, %v530_v3 }
  0x68   :  { %v228_v41 = vadd.f32 %v224_v40, %v202_v27  ;;  %v302_v44 = vmul.f32 %v647_v52, %v297_v32  ;;  %v95_v14 = vmul.f32 %v537_v9, %v90_v35  ;;  %v184_v26 = vmul.f32 %v600_v51, %v530_v3 }
  0x69   :  { %v328_v45 = vmul.f32 %v660_v13, %v323_v36  ;;  %v116_v47 = vmax.f32 %v112_v37, 0.0  ;;  %v142_v0 = vmax.f32 %v138_v6, 0.0  ;;  %v164_v49 = vadd.f32 %v591_v43, %v158_v12 }
  0x6a   :  { %v254_v18 = vadd.f32 %v250_v39, %v228_v41  ;;  %v190_v31 = vadd.f32 %v605_v55, %v184_v26  ;;  %v210_v38 = vmul.f32 %v613_v63, %v530_v3  ;;  %v236_v50 = vmul.f32 %v625_v23, %v530_v3 }
  0x6b   :  { %v121_v9 = vmul.f32 %v539_v10, %v116_v47  ;;  %v147_v53 = vmul.f32 %v562_v22, %v142_v0  ;;  %v168_v51 = vmax.f32 %v164_v49, 0.0  ;;  %v262_v54 = vmul.f32 %v638_v42, %v530_v3 }
  0x6c   :  { %v280_v56 = vadd.f32 %v276_v2, %v254_v18  ;;  %v194_v57 = vmax.f32 %v190_v31, 0.0  ;;  %v216_v43 = vadd.f32 %v619_v8, %v210_v38  ;;  %v242_v55 = vadd.f32 %v631_v29, %v236_v50 }
  0x6d   :  { %v125_v61 = vadd.f32 %v121_v9, %v95_v14  ;;  %v173_v63 = vmul.f32 %v577_v34, %v168_v51  ;;  %v268_v62 = vadd.f32 %v644_v48, %v262_v54  ;;  %v288_v10 = vmul.f32 %v652_v59, %v530_v3 }
  0x6e   :  { %v306_v23 = vadd.f32 %v302_v44, %v280_v56  ;;  %v199_v22 = vmul.f32 %v594_v46, %v194_v57  ;;  %v220_v1 = vmax.f32 %v216_v43, 0.0  ;;  %v246_v42 = vmax.f32 %v242_v55, 0.0 }
  0x6f   :  { %v151_v28 = vadd.f32 %v147_v53, %v125_v61  ;;  %v294_v40 = vadd.f32 %v657_v4, %v288_v10  ;;  %v314_v8 = vmul.f32 %v666_v21, %v530_v3  ;;  %v272_v7 = vmax.f32 %v268_v62, 0.0 }
  0x70   :  { %v332_v29 = vadd.f32 %v328_v45, %v306_v23  ;;  %v225_v34 = vmul.f32 %v607_v58, %v220_v1  ;;  %v251_v46 = vmul.f32 %v621_v16, %v246_v42 }
  0x71   :  { %v177_v5 = vadd.f32 %v173_v63, %v151_v28  ;;  %v320_v48 = vadd.f32 %v671_v30, %v314_v8  ;;  %v298_v17 = vmax.f32 %v294_v40, 0.0  ;;  %v277_v4 = vmul.f32 %v633_v33, %v272_v7 }
  0x72   :  { %v338_v59 = vadd.f32 %v544_v11, %v332_v29 }
  0x73   :  { %v203_v15 = vadd.f32 %v199_v22, %v177_v5  ;;  %v324_v60 = vmax.f32 %v320_v48, 0.0  ;;  %v303_v3 = vmul.f32 %v647_v52, %v298_v17 }
  0x74   :  { %342 = vst [vmem:[#allocation11 + $0x10] sm:$0xff] %v338_v59 }
  0x75   :  { %v229_v19 = vadd.f32 %v225_v34, %v203_v15  ;;  %v329_v58 = vmul.f32 %v660_v13, %v324_v60 }
  0x77   :  { %v255_v39 = vadd.f32 %v251_v46, %v229_v19 }
  0x79   :  { %v281_v21 = vadd.f32 %v277_v4, %v255_v39 }
  0x7b   :  { %v307_v20 = vadd.f32 %v303_v3, %v281_v21 }
  0x7d   :  { %v333_v30 = vadd.f32 %v329_v58, %v307_v20 }
  0x7f   :  { %v339_v24 = vadd.f32 %v544_v11, %v333_v30 }
  0x81   :  { %343 = vst [vmem:[#allocation11 + $0x18] sm:$0xff] %v339_v24 }
  0x82   :  { %460 = shalt.err (!%p457_p10)
}
  0x83   :  { %353 = dma.vmem_to_hbm [thread:$0]  %s351_s12, 512, %s774_s5, [#allocation5]  }
  0x84   :  { %475 = dma.done.wait [#allocation5], 512  }
  0x85   :  { %476 = vsyncadd [#allocation5], 4294966784 }
  0x86   :  { %357 = vsyncpa [#allocation4], 1 }
  0x87   :  { %358 = vsyncpa [#allocation5], 1 }
  0x88   :  { %359 = vsyncpa [#allocation6], 1 }
  0x89   :  { %360 = vsyncpa [#allocation9], 1 }

</bundles_post_ra>
